<compile_context>
chip_gen: v7x
topology: tpu7x:2x2x1
jax: 0.10.0
libtpu: 0.0.40
codegen_flags: <defaults>
</compile_context>

<pallas_src>
import functools

import jax
import jax.numpy as jnp
from jax import lax
from jax.experimental import pallas as pl
from jax.experimental.pallas import tpu as pltpu


def _w8a16_linear_kernel(x_ref, w_ref, s_ref, o_ref, acc_ref):
    """One (tm, tn) output tile; grid axis 2 walks the K reduction.

    x_ref: (tm, tk) activations (bf16/f32)
    w_ref: (tn, tk) int8 weights in native (out_features, in_features) layout
    s_ref: (1, tn)  per-output-channel scales
    """
    k = pl.program_id(2)

    @pl.when(k == 0)
    def _():
        acc_ref[...] = jnp.zeros_like(acc_ref)

    # In-kernel dequantization (matches `weight.to(dtype=input.dtype)`), then
    # matmul on the MXU with an f32 accumulator.  dot_general contracts the K
    # axis of both operands, so no transposed copy of the weight is ever made.
    w_deq = w_ref[...].astype(x_ref.dtype)            # (tn, tk)
    acc_ref[...] += lax.dot_general(
        x_ref[...],
        w_deq,
        dimension_numbers=(((1,), (1,)), ((), ())),   # x K  <->  w K
        preferred_element_type=jnp.float32,
    )

    @pl.when(k == pl.num_programs(2) - 1)
    def _():
        # Per-output-channel scale (broadcast over rows), then cast back to
        # the activation dtype.
        scales = s_ref[...].astype(jnp.float32)       # (1, tn)
        o_ref[...] = (acc_ref[...] * scales).astype(o_ref.dtype)


def _round_up(v, m):
    return ((v + m - 1) // m) * m


def _pick_tile(dim, preferred):
    """Largest tile from (preferred, 512, 256, 128) that divides dim, else dim."""
    for cand in (preferred, 512, 256, 128):
        if cand <= dim and dim % cand == 0:
            return cand
    return dim  # full-extent block (always a legal block shape)


@functools.partial(jax.jit, static_argnames=("tm_cap", "tn", "tk"))
def weight_only_int8_linear(x, weight_i8, scales, *, tm_cap=512, tn=512, tk=512):
    """x: (..., K) bf16/f32; weight_i8: (N, K) int8 (native layout); scales: (N,)."""
    *lead, K = x.shape
    N, Kw = weight_i8.shape
    assert Kw == K, f"weight shape {weight_i8.shape} incompatible with K={K}"
    assert scales.shape == (N,)

    x2d = x.reshape(-1, K)
    M = x2d.shape[0]

    # Tile selection: lane-dense, dim-dividing tiles for N/K; VMEM-capped tm.
    tk = _pick_tile(K, tk)
    tn = _pick_tile(N, tn)
    tm = min(tm_cap, _round_up(M, 8))
    m_pad = _round_up(M, tm)
    if m_pad != M:
        x2d = jnp.pad(x2d, ((0, m_pad - M), (0, 0)))

    # Scales presented as a (1, N) row (cheap reshape, no weight transpose).
    s2d = scales.reshape(1, N)

    grid = (m_pad // tm, N // tn, K // tk)

    # Explicit VMEM budget for this tiling (double-buffered inputs/outputs,
    # single f32 accumulator), with headroom; clamped so it stays portable on
    # v7x's 64 MiB physical VMEM.
    x_bytes = jnp.dtype(x.dtype).itemsize
    vmem_budget = (
        tm * tn * 4                 # f32 accumulator scratch
        + 2 * tm * tk * x_bytes     # double-buffered activation tiles
        + 2 * tn * tk * 1           # double-buffered int8 weight tiles
        + 2 * tm * tn * x_bytes     # double-buffered output tiles
        + 2 * tn * 2                # scales row
    )
    vmem_limit = min(max(int(vmem_budget * 1.5) + (2 << 20), 16 << 20), 64 << 20)

    out2d = pl.pallas_call(
        _w8a16_linear_kernel,
        out_shape=jax.ShapeDtypeStruct((m_pad, N), x.dtype),
        grid_spec=pltpu.PrefetchScalarGridSpec(
            num_scalar_prefetch=0,
            grid=grid,
            in_specs=[
                pl.BlockSpec((tm, tk), lambda i, j, k: (i, k)),   # activations
                pl.BlockSpec((tn, tk), lambda i, j, k: (j, k)),   # int8 weight, native (N, K)
                pl.BlockSpec((1, tn), lambda i, j, k: (0, j)),    # scales row
            ],
            out_specs=pl.BlockSpec((tm, tn), lambda i, j, k: (i, j)),
            scratch_shapes=[pltpu.VMEM((tm, tn), jnp.float32)],
        ),
        compiler_params=pltpu.CompilerParams(
            dimension_semantics=("parallel", "parallel", "arbitrary"),
            vmem_limit_bytes=vmem_limit,
        ),
    )(x2d, weight_i8, s2d)

    if m_pad != M:
        out2d = out2d[:M]
    return out2d.reshape(*lead, N)


if __name__ == "__main__":
    # Small shapes consistent with the module: batch=2, seq=8,
    # in_features=128, out_features=256.
    B, S, K, N = 2, 8, 128, 256

    key = jax.random.PRNGKey(0)
    kx, kw, ks = jax.random.split(key, 3)

    x = jax.random.normal(kx, (B, S, K), dtype=jnp.float32).astype(jnp.bfloat16)
    weight_i8 = jax.random.randint(kw, (N, K), -128, 128, dtype=jnp.int8)
    scales = (jax.random.uniform(ks, (N,), dtype=jnp.float32) * 0.1 + 0.01).astype(
        jnp.bfloat16
    )

    out = weight_only_int8_linear(x, weight_i8, scales)
    out = jax.block_until_ready(out)

    # Reference (plain JAX) for a sanity check, matching PyTorch semantics:
    #   F.linear(x, w.to(x.dtype)) * scales
    ref = (
        jnp.einsum(
            "bsk,nk->bsn",
            x.astype(jnp.float32),
            weight_i8.astype(jnp.float32),
        )
        * scales.astype(jnp.float32)[None, None, :]
    )
    assert out.shape == (B, S, N) and out.dtype == jnp.bfloat16
    err = jnp.max(jnp.abs(out.astype(jnp.float32) - ref)) / (jnp.max(jnp.abs(ref)) + 1e-6)
    assert float(err) < 2e-2, f"relative error too high: {float(err)}"

    print("KERNEL_OK")
</pallas_src>

<mosaic_0001>
module attributes {stable_mosaic.version = 11 : i64} {
  func.func @_w8a16_linear_kernel(%arg0: i32, %arg1: i32, %arg2: i32, %arg3: memref<16x128xbf16, #tpu.memory_space<vmem>>, %arg4: memref<256x128xi8, #tpu.memory_space<vmem>>, %arg5: memref<1x256xbf16, #tpu.memory_space<vmem>>, %arg6: memref<16x256xbf16, #tpu.memory_space<vmem>>, %arg7: memref<16x256xf32, #tpu.memory_space<vmem>>) attributes {dimension_semantics = [#tpu.dimension_semantics<parallel>, #tpu.dimension_semantics<parallel>, #tpu.dimension_semantics<arbitrary>], iteration_bounds = array<i64: 1, 1, 1>, scalar_prefetch = 0 : i64, scratch_operands = 1 : i64, tpu.core_type = #tpu.core_type<tc>, window_params = [{transform_indices = @transform_0, window_bounds = array<i64: 16, 128>}, {transform_indices = @transform_1, window_bounds = array<i64: 256, 128>}, {transform_indices = @transform_2, window_bounds = array<i64: 1, 256>}, {transform_indices = @transform_3, window_bounds = array<i64: 16, 256>}]} {
    %c0_i32 = arith.constant 0 : i32
    %0 = arith.cmpi eq, %arg2, %c0_i32 : i32
    %1 = arith.extui %0 : i1 to i32
    %c0_i32_0 = arith.constant 0 : i32
    %2 = arith.cmpi ne, %1, %c0_i32_0 : i32
    scf.if %2 {
      %cst_10 = arith.constant 0.000000e+00 : f32
      %13 = vector.broadcast %cst_10 : f32 to vector<16x256xf32>
      %c0_11 = arith.constant 0 : index
      %c0_12 = arith.constant 0 : index
      %14 = vector.load %arg7[%c0_11, %c0_12] : memref<16x256xf32, #tpu.memory_space<vmem>>, vector<16x256xf32>
      tpu.vector_store %arg7[%c0_11, %c0_12], %13 {strides = array<i32>} : memref<16x256xf32, #tpu.memory_space<vmem>>, vector<16x256xf32>,
    } else {
    }
    %c0 = arith.constant 0 : index
    %c0_1 = arith.constant 0 : index
    %3 = vector.load %arg4[%c0, %c0_1] : memref<256x128xi8, #tpu.memory_space<vmem>>, vector<256x128xi8>
    %4 = arith.sitofp %3 : vector<256x128xi8> to vector<256x128xbf16>
    %c0_2 = arith.constant 0 : index
    %c0_3 = arith.constant 0 : index
    %5 = vector.load %arg7[%c0_2, %c0_3] : memref<16x256xf32, #tpu.memory_space<vmem>>, vector<16x256xf32>
    %c0_4 = arith.constant 0 : index
    %c0_5 = arith.constant 0 : index
    %6 = vector.load %arg3[%c0_4, %c0_5] : memref<16x128xbf16, #tpu.memory_space<vmem>>, vector<16x128xbf16>
    %cst = arith.constant dense<0.000000e+00> : vector<16x256xf32>
    %7 = tpu.matmul %6, %4, %cst {dimension_numbers = #tpu.dot_dimension_numbers<[1], [1], [0], [0], [0, 0, 1, 0], [], []>} : vector<16x128xbf16>, vector<256x128xbf16>, vector<16x256xf32> -> vector<16x256xf32>
    %8 = arith.addf %5, %7 : vector<16x256xf32>
    %c0_6 = arith.constant 0 : index
    %c0_7 = arith.constant 0 : index
    %9 = vector.load %arg7[%c0_6, %c0_7] : memref<16x256xf32, #tpu.memory_space<vmem>>, vector<16x256xf32>
    tpu.vector_store %arg7[%c0_6, %c0_7], %8 {strides = array<i32>} : memref<16x256xf32, #tpu.memory_space<vmem>>, vector<16x256xf32>,
    %c0_i32_8 = arith.constant 0 : i32
    %10 = arith.cmpi eq, %arg2, %c0_i32_8 : i32
    %11 = arith.extui %10 : i1 to i32
    %c0_i32_9 = arith.constant 0 : i32
    %12 = arith.cmpi ne, %11, %c0_i32_9 : i32
    scf.if %12 {
      %c0_10 = arith.constant 0 : index
      %c0_11 = arith.constant 0 : index
      %13 = vector.load %arg5[%c0_10, %c0_11] : memref<1x256xbf16, #tpu.memory_space<vmem>>, vector<1x256xbf16>
      %14 = arith.extf %13 : vector<1x256xbf16> to vector<1x256xf32>
      %c0_12 = arith.constant 0 : index
      %c0_13 = arith.constant 0 : index
      %15 = vector.load %arg7[%c0_12, %c0_13] : memref<16x256xf32, #tpu.memory_space<vmem>>, vector<16x256xf32>
      %16 = vector.broadcast %14 : vector<1x256xf32> to vector<16x256xf32>
      %17 = arith.mulf %15, %16 : vector<16x256xf32>
      %18 = arith.truncf %17 : vector<16x256xf32> to vector<16x256xbf16>
      %c0_14 = arith.constant 0 : index
      %c0_15 = arith.constant 0 : index
      %19 = vector.load %arg6[%c0_14, %c0_15] : memref<16x256xbf16, #tpu.memory_space<vmem>>, vector<16x256xbf16>
      tpu.vector_store %arg6[%c0_14, %c0_15], %18 {strides = array<i32>} : memref<16x256xbf16, #tpu.memory_space<vmem>>, vector<16x256xbf16>,
    } else {
    }
    return
  }
  func.func @transform_0(%arg0: i32, %arg1: i32, %arg2: i32) -> (i32, i32) {
    %c0_i32 = arith.constant 0 : i32
    return %arg0, %arg2 : i32, i32
  }
  func.func @transform_1(%arg0: i32, %arg1: i32, %arg2: i32) -> (i32, i32) {
    %c0_i32 = arith.constant 0 : i32
    return %arg1, %arg2 : i32, i32
  }
  func.func @transform_2(%arg0: i32, %arg1: i32, %arg2: i32) -> (i32, i32) {
    %c0_i32 = arith.constant 0 : i32
    %c0_i32_0 = arith.constant 0 : i32
    return %c0_i32, %arg1 : i32, i32
  }
  func.func @transform_3(%arg0: i32, %arg1: i32, %arg2: i32) -> (i32, i32) {
    %c0_i32 = arith.constant 0 : i32
    return %arg0, %arg1 : i32, i32
  }
}

</mosaic_0001>

<bundles_post_ra>
// kernel: weight_only_int8_linear.1
= control target key start
LH: loop header
LB: loop body
LE: loop exit
PB: predicated region body
PF: predicated region fallthrough
CT: control target
= control target key end

     0   :  { %8 = vsyncpa [#allocation4], 0  ;;  %s378_s0 = inlined_call_operand.hbm [shape: bf16[16,128], index: 0, kind: input, shape index: {}]   ;;  %s379_s1 = inlined_call_operand.hbm [shape: s8[256,128], index: 1, kind: input, shape index: {}]   ;;  %s380_s2 = inlined_call_operand.vmem [shape: bf16[1,256], index: 2, kind: input, shape index: {}]   ;;  %s381_s3 = inlined_call_operand.hbm [shape: bf16[16,256], index: 3, kind: output, shape index: {}]  }
   0x1   :  { %9 = vsyncpa [#allocation7], 0 }
   0x2   :  { %10 = vsyncpa [#allocation5], 0  ;;  %s306_s12 = smov [#allocation3]   ;;  %s234_s16 = scalar_lea.hbm %s378_s0, 128 }
   0x3   :  { %s16_s13 = sshll.u32 %s306_s12, 4  ;;  %p235_p0 = scmp.ne.s32.totalorder %s378_s0, %s234_s16  ;;  %s17_s13 = int_to_ptr.vmem [resolvable:$true] %s16_s13 }
   0x4   :  { %p238_p1 = scmp.lt.u32.totalorder %s234_s16, %s378_s0 }
   0x6   :  { %p240_p2 = pnand %p238_p1, %p235_p0 }
   0x8   :  { %243 = shalt.err (!%p240_p2)
}
   0x9   :  { %s244_s21 = scalar_lea.vmem %s17_s13, 128  ;;  %p249_p4 = scmp.lt.s32.totalorder %s17_s13, %s17_s13 }
   0xa   :  { %p245_p3 = scmp.ne.s32.totalorder %s17_s13, %s244_s21  ;;  %p250_p5 = scmp.lt.s32.totalorder %s244_s21, %s244_s21 }
   0xc   :  { %p251_p6 = por %p250_p5, %p249_p4 }
   0xe   :  { %p252_p7 = pnand %p251_p6, %p245_p3 }
  0x10   :  { %255 = shalt.err (!%p252_p7)
}
  0x11   :  { %s307_s22 = smov 64   ;;  %s308_s23 = smov 4  }
  0x12   :  { %22 = dma.hbm_to_vmem [thread:$0]  %s378_s0, 128, %s17_s13, [#allocation4], %s307_s22, %s307_s22, %s308_s23  }
  0x13   :  { %s309_s26 = smov [#allocation6]   ;;  %s256_s30 = scalar_lea.hbm %s379_s1, 1024 }
  0x14   :  { %s28_s27 = sshll.u32 %s309_s26, 4  ;;  %p257_p8 = scmp.ne.s32.totalorder %s379_s1, %s256_s30  ;;  %s29_s27 = int_to_ptr.vmem [resolvable:$true] %s28_s27 }
  0x15   :  { %p260_p9 = scmp.lt.u32.totalorder %s256_s30, %s379_s1 }
  0x17   :  { %p262_p10 = pnand %p260_p9, %p257_p8 }
  0x19   :  { %265 = shalt.err (!%p262_p10)
}
  0x1a   :  { %s266_s8 = scalar_lea.vmem %s29_s27, 1024  ;;  %p271_p12 = scmp.lt.s32.totalorder %s29_s27, %s29_s27 }
  0x1b   :  { %p267_p11 = scmp.ne.s32.totalorder %s29_s27, %s266_s8  ;;  %p272_p13 = scmp.lt.s32.totalorder %s266_s8, %s266_s8 }
  0x1d   :  { %p273_p0 = por %p272_p13, %p271_p12 }
  0x1f   :  { %p274_p1 = pnand %p273_p0, %p267_p11 }
  0x21   :  { %277 = shalt.err (!%p274_p1)
}
  0x22   :  { %s310_s0 = smov 128   ;;  %s311_s9 = smov 8  }
  0x23   :  { %34 = dma.hbm_to_vmem [thread:$0]  %s379_s1, 1024, %s29_s27, [#allocation7], %s310_s0, %s310_s0, %s311_s9  }
  0x24   :  { %300 = dma.done.wait [#allocation4], 128  }
  0x25   :  { %301 = vsyncadd [#allocation4], 4294967168 }
  0x26   :  { %302 = dma.done.wait [#allocation7], 1024  }
  0x27   :  { %303 = vsyncadd [#allocation7], 4294966272  ;;  %v56_v0 = vld [vmem:[#allocation6 + $0x20] sm:$0xff]  ;;  %v233_v5 = vld [vmem:[#allocation3] sm:$0xff]   ;;  %v149_v25 = vlaneseq  ;;  %s312_s13 = smov [#allocation8]  }
  0x28   :  { %v52_v1 = vld [vmem:[#allocation6] sm:$0xff]  ;;  %v68_v2 = vunpack.c.l.s8.bf16 %v56_v0  ;;  %v69_v3 = vunpack.c.h.s8.bf16 %v56_v0  ;;  %224 = vmatprep.mubr.bf16.mxu0 %v233_v5  ;;  %v57_v6 = vld [vmem:[#allocation6 + $0x28] sm:$0xff]  ;;  %v58_v12 = vld [vmem:[#allocation6 + $0x30] sm:$0xff]  ;;  %s190_s14 = sshll.u32 %s312_s13, 4  ;;  %s191_s14 = int_to_ptr.vmem [resolvable:$true] %s190_s14 }
  0x29   :  { %v60_v4 = vunpack.c.l.s8.bf16 %v52_v1  ;;  %v61_v7 = vunpack.c.h.s8.bf16 %v52_v1  ;;  %v70_v8 = vunpack.c.l.s8.bf16 %v57_v6  ;;  %v53_v9 = vld [vmem:[#allocation6 + $0x8] sm:$0xff]  ;;  %v71_v11 = vunpack.c.h.s8.bf16 %v57_v6  ;;  %v54_v15 = vld [vmem:[#allocation6 + $0x10] sm:$0xff]  ;;  %v59_v18 = vld [vmem:[#allocation6 + $0x38] sm:$0xff]  ;;  %p283_p3 = scmp.lt.s32.totalorder %s191_s14, %s191_s14 }
  0x2a   :  { %208 = vmatprep.subr.bf16.mxu0 %v68_v2  ;;  %v62_v10 = vunpack.c.l.s8.bf16 %v53_v9  ;;  %v63_v13 = vunpack.c.h.s8.bf16 %v53_v9  ;;  %v72_v14 = vunpack.c.l.s8.bf16 %v58_v12  ;;  %v64_v16 = vunpack.c.l.s8.bf16 %v54_v15  ;;  %v55_v21 = vld [vmem:[#allocation6 + $0x18] sm:$0xff] }
  0x2b   :  { %209 = vmatpush3.bf16.xpose.msra.mxu0 %v60_v4  ;;  %v73_v17 = vunpack.c.h.s8.bf16 %v58_v12  ;;  %v65_v19 = vunpack.c.h.s8.bf16 %v54_v15  ;;  %v74_v20 = vunpack.c.l.s8.bf16 %v59_v18  ;;  %v66_v22 = vunpack.c.l.s8.bf16 %v55_v21  ;;  %v142_v27 = vld [vmem:[%s380_s2] sm:$0x3]  ;;  %s278_s2 = scalar_lea.vmem %s191_s14, 256 }
  0x2c   :  { %210 = vmatprep.subr.bf16.mxu0 %v69_v3  ;;  %v75_v23 = vunpack.c.h.s8.bf16 %v59_v18  ;;  %v67_v24 = vunpack.c.h.s8.bf16 %v55_v21  ;;  %v150_v26 = vshrl.u32 %v149_v25, 7  ;;  %v143_v28 = vunpack.c.l.bf16 %v142_v27  ;;  %p279_p2 = scmp.ne.s32.totalorder %s191_s14, %s278_s2  ;;  %p284_p4 = scmp.lt.s32.totalorder %s278_s2, %s278_s2 }
  0x2e   :  { %v151_v29 = vsub.s32 0, %v150_v26  ;;  %v155_v30 = vsub.s32 2, %v150_v26  ;;  %p285_p5 = por %p284_p4, %p283_p3 }
  0x30   :  { %v152_v31 = vrot.slane %v143_v28, %v151_v29  ;;  %v156_v32 = vrot.slane %v143_v28, %v155_v30  ;;  %p286_p6 = pnand %p285_p5, %p279_p2 }
  0x32   :  { %v162_v33 = vrot.slane %v152_v31, %v151_v29  ;;  %v166_v34 = vrot.slane %v156_v32, %v151_v29 }
  0x33   :  { %211 = vmatpush3.bf16.xpose.msra.mxu0 %v61_v7 }
  0x34   :  { %212 = vmatprep.subr.bf16.mxu0 %v70_v8 }
  0x3b   :  { %213 = vmatpush3.bf16.xpose.msra.mxu0 %v62_v10 }
  0x3c   :  { %214 = vmatprep.subr.bf16.mxu0 %v71_v11 }
  0x43   :  { %215 = vmatpush3.bf16.xpose.msra.mxu0 %v63_v13 }
  0x44   :  { %216 = vmatprep.subr.bf16.mxu0 %v72_v14 }
  0x4b   :  { %217 = vmatpush3.bf16.xpose.msra.mxu0 %v64_v16 }
  0x4c   :  { %218 = vmatprep.subr.bf16.mxu0 %v73_v17 }
  0x53   :  { %219 = vmatpush3.bf16.xpose.msra.mxu0 %v65_v19 }
  0x54   :  { %220 = vmatprep.subr.bf16.mxu0 %v74_v20 }
  0x5b   :  { %221 = vmatpush3.bf16.xpose.msra.mxu0 %v66_v22 }
  0x5c   :  { %222 = vmatprep.subr.bf16.mxu0 %v75_v23 }
  0x63   :  { %223 = vmatpush3.bf16.xpose.msra.mxu0 %v67_v24 }
  0x6a   :  { %225 = vmatmul.mubr.bf16.vlgmr.msra.gmra.mrb[0].mxu0 %v233_v5 }
 0x13d   :  { %v122_v35 = vpop.f32.mrb[0].mxu0 }
 0x13e   :  { %v167_v36 = vmul.f32 %v162_v33, %v122_v35  ;;  %v124_v37 = vpop.f32.mrb[1].mxu0 }
 0x13f   :  { %v168_v38 = vmul.f32 %v166_v34, %v124_v37  ;;  %v126_v39 = vpop.f32.mrb[2].mxu0 }
 0x140   :  { %v169_v40 = vmul.f32 %v162_v33, %v126_v39  ;;  %v128_v41 = vpop.f32.mrb[3].mxu0 }
 0x141   :  { %v206_v42 = vpack.c.bf16 %v168_v38, %v167_v36  ;;  %v170_v43 = vmul.f32 %v166_v34, %v128_v41 }
 0x143   :  { %183 = vst [vmem:[#allocation8] sm:$0xff] %v206_v42  ;;  %v207_v44 = vpack.c.bf16 %v170_v43, %v169_v40 }
 0x145   :  { %184 = vst [vmem:[#allocation8 + $0x8] sm:$0xff] %v207_v44 }
 0x146   :  { %289 = shalt.err (!%p286_p6)
}
 0x147   :  { %s290_s17 = scalar_lea.hbm %s381_s3, 256 }
 0x148   :  { %p291_p7 = scmp.ne.s32.totalorder %s381_s3, %s290_s17  ;;  %p294_p8 = scmp.lt.u32.totalorder %s290_s17, %s381_s3 }
 0x14a   :  { %p296_p9 = pnand %p294_p8, %p291_p7 }
 0x14c   :  { %299 = shalt.err (!%p296_p9)
}
 0x14d   :  { %196 = dma.vmem_to_hbm [thread:$0]  %s191_s14, 256, %s381_s3, [#allocation5], %s310_s0, %s310_s0, %s311_s9  }
 0x14e   :  { %304 = dma.done.wait [#allocation5], 256  }
 0x14f   :  { %305 = vsyncadd [#allocation5], 4294967040 }
 0x150   :  { %200 = vsyncpa [#allocation4], 1 }
 0x151   :  { %201 = vsyncpa [#allocation7], 1 }
 0x152   :  { %202 = vsyncpa [#allocation5], 1 }

</bundles_post_ra>
